<compile_context>
chip_gen: v7x
topology: tpu7x:2x2x1
jax: 0.10.0
libtpu: 0.0.40
codegen_flags: <defaults>
</compile_context>

<pallas_src>
import math
import functools

import jax
import jax.numpy as jnp
from jax.experimental import pallas as pl
from jax.experimental.pallas import tpu as pltpu


def _round_up(n, m):
    return ((n + m - 1) // m) * m


@functools.lru_cache(maxsize=None)
def _vmem_limit_bytes():
    """Per-generation scoped-VMEM budget: ~96 MiB on v5e/v6e (128 MiB phys), ~40 MiB on v7x."""
    try:
        cap = int(pltpu.get_tpu_info().vmem_capacity_bytes)
    except Exception:
        cap = 64 * 1024 * 1024
    if cap >= 100 * 1024 * 1024:
        return 96 * 1024 * 1024
    return max(32 * 1024 * 1024, min(cap // 2 + (8 << 20), 40 * 1024 * 1024))


# --------------------------------------------------------------------------- #
# Fused multi-head attention + residual + LayerNorm.  One grid step per batch.
# --------------------------------------------------------------------------- #
def attn_ln_kernel(x_ref, kv_ref, bias_ref,
                   wq_ref, bq_ref, wkv_ref, bkv_ref, wo_ref, bo_ref,
                   g_ref, be_ref, out_ref, *, num_heads):
    x = x_ref[0]            # (Lq, D) f32 — also the residual input
    kv = kv_ref[0]          # (Lk, D) f32
    bias = bias_ref[0]      # (Mq, Lk) f32 additive mask bias (already * -1e9), Mq in {1, Lq}

    Lq, D = x.shape
    Lk = kv.shape[0]
    H = num_heads
    dk = D // H

    xb = x.astype(jnp.bfloat16)
    kvb = kv.astype(jnp.bfloat16)

    # Lane-dense fused projections (MXU N = D and N = 2D).  The 1/sqrt(dk) scale is folded
    # into wq/bq at init, so no per-score multiply is needed later.
    q2 = jnp.dot(xb, wq_ref[...], preferred_element_type=jnp.float32) + bq_ref[...]      # (Lq, D)
    kv2 = jnp.dot(kvb, wkv_ref[...], preferred_element_type=jnp.float32) + bkv_ref[...]  # (Lk, 2D)

    # Head split only for the score/context contractions.
    q = jnp.transpose(q2.reshape(Lq, H, dk), (1, 0, 2)).astype(jnp.bfloat16)           # (H, Lq, dk)
    k = jnp.transpose(kv2[:, :D].reshape(Lk, H, dk), (1, 0, 2)).astype(jnp.bfloat16)   # (H, Lk, dk)
    v = jnp.transpose(kv2[:, D:].reshape(Lk, H, dk), (1, 0, 2)).astype(jnp.bfloat16)   # (H, Lk, dk)

    # Scores (all heads at once), additive mask bias, stable softmax — all in f32.
    s = jnp.einsum('hqd,hkd->hqk', q, k, preferred_element_type=jnp.float32)           # (H, Lq, Lk)
    s = s + bias[None]
    s = s - jnp.max(s, axis=-1, keepdims=True)
    e = jnp.exp(s)
    p = e * pl.reciprocal(jnp.sum(e, axis=-1, keepdims=True), approx=True)

    ctx = jnp.einsum('hqk,hkd->hqd', p.astype(jnp.bfloat16), v,
                     preferred_element_type=jnp.float32)                               # (H, Lq, dk)

    # Merge heads back into D lanes; single lane-dense output projection (contraction K = D).
    ctx2 = jnp.transpose(ctx, (1, 0, 2)).reshape(Lq, D).astype(jnp.bfloat16)
    attn = jnp.dot(ctx2, wo_ref[...], preferred_element_type=jnp.float32) + bo_ref[...]

    # Fused residual + LayerNorm epilogue (biased variance, eps=1e-6, f32 stats).
    z = x + attn
    mean = jnp.mean(z, axis=-1, keepdims=True)
    c = z - mean
    var = jnp.mean(c * c, axis=-1, keepdims=True)
    out_ref[0] = (c * jax.lax.rsqrt(var + 1e-6)) * g_ref[...] + be_ref[...]


def attn_ln(q_in, kv_in, bias, p, gamma, beta, num_heads):
    """LayerNorm(q_in + MHA(q_in, kv_in, kv_in, mask)) as a single pallas_call."""
    B, Lq, D = q_in.shape
    Lk = kv_in.shape[1]
    Bm, Mq, _ = bias.shape
    assert Bm in (1, B) and Mq in (1, Lq)

    bias_map = (lambda b: (0, 0, 0)) if Bm == 1 else (lambda b: (b, 0, 0))
    c2 = lambda b: (0, 0)

    kernel = functools.partial(attn_ln_kernel, num_heads=num_heads)
    return pl.pallas_call(
        kernel,
        out_shape=jax.ShapeDtypeStruct((B, Lq, D), jnp.float32),
        grid=(B,),
        in_specs=[
            pl.BlockSpec((1, Lq, D), lambda b: (b, 0, 0)),
            pl.BlockSpec((1, Lk, D), lambda b: (b, 0, 0)),
            pl.BlockSpec((1, Mq, Lk), bias_map),   # un-broadcast additive mask bias
            pl.BlockSpec((D, D), c2),              # wq  (1/sqrt(dk) folded in, bf16)
            pl.BlockSpec((1, D), c2),              # bq
            pl.BlockSpec((D, 2 * D), c2),          # wkv = [wk | wv]  (bf16)
            pl.BlockSpec((1, 2 * D), c2),          # bkv
            pl.BlockSpec((D, D), c2),              # wo  (bf16)
            pl.BlockSpec((1, D), c2),              # bo
            pl.BlockSpec((1, D), c2),              # gamma
            pl.BlockSpec((1, D), c2),              # beta
        ],
        out_specs=pl.BlockSpec((1, Lq, D), lambda b: (b, 0, 0)),
        compiler_params=pltpu.CompilerParams(
            dimension_semantics=("parallel",),
            vmem_limit_bytes=_vmem_limit_bytes()),
    )(q_in, kv_in, bias, p['wq'], p['bq'], p['wkv'], p['bkv'], p['wo'], p['bo'],
      gamma, beta)


# --------------------------------------------------------------------------- #
# Fused position-wise FFN + residual + LayerNorm, row-tiled over (B*L) with padding.
# --------------------------------------------------------------------------- #
def ffn_ln_kernel(x_ref, w1_ref, b1_ref, w2_ref, b2_ref, g_ref, be_ref, o_ref):
    x = x_ref[...]                                               # (TM, D) f32
    h = jnp.dot(x.astype(jnp.bfloat16), w1_ref[...],
                preferred_element_type=jnp.float32) + b1_ref[...]
    # bf16 ReLU intermediate: halves the (TM, dff) live tensor (native on v6e/v7x VPUs).
    h = jnp.maximum(h.astype(jnp.bfloat16), 0)
    f = jnp.dot(h, w2_ref[...], preferred_element_type=jnp.float32) + b2_ref[...]
    z = x + f
    mean = jnp.mean(z, axis=-1, keepdims=True)
    c = z - mean
    var = jnp.mean(c * c, axis=-1, keepdims=True)
    o_ref[...] = (c * jax.lax.rsqrt(var + 1e-6)) * g_ref[...] + be_ref[...]


def _pick_row_tile(rows, d_model, dff, vmem_limit, target=512):
    """Multiple-of-8 row tile capped by a conservative VMEM bound (never full-extent fallback)."""
    # Per-row f32 footprint: double-buffered in/out tiles + LN temporaries + bf16/f32 hidden.
    per_row = 4 * (4 * d_model + 2 * dff) + 2 * dff
    weight_bytes = 2 * 2 * 2 * d_model * dff            # bf16 w1 + w2, double-buffered
    avail = max(vmem_limit - weight_bytes, 2 << 20)
    cap = max(8, (avail // per_row) // 8 * 8)
    tm = min(target, cap, _round_up(rows, 8))
    return max(8, (tm // 8) * 8)


def ffn_ln(x, p, gamma, beta, *, row_tile=512):
    B, L, D = x.shape
    dff = p['w1'].shape[1]
    rows = B * L
    tm = _pick_row_tile(rows, D, dff, _vmem_limit_bytes(), row_tile)
    rows_p = _round_up(rows, tm)

    x2 = x.reshape(rows, D)
    if rows_p != rows:
        x2 = jnp.pad(x2, ((0, rows_p - rows), (0, 0)))   # padded rows are sliced off below

    out = pl.pallas_call(
        ffn_ln_kernel,
        out_shape=jax.ShapeDtypeStruct((rows_p, D), jnp.float32),
        grid=(rows_p // tm,),
        in_specs=[
            pl.BlockSpec((tm, D), lambda i: (i, 0)),
            pl.BlockSpec((D, dff), lambda i: (0, 0)),
            pl.BlockSpec((1, dff), lambda i: (0, 0)),
            pl.BlockSpec((dff, D), lambda i: (0, 0)),
            pl.BlockSpec((1, D), lambda i: (0, 0)),
            pl.BlockSpec((1, D), lambda i: (0, 0)),
            pl.BlockSpec((1, D), lambda i: (0, 0)),
        ],
        out_specs=pl.BlockSpec((tm, D), lambda i: (i, 0)),
        compiler_params=pltpu.CompilerParams(
            dimension_semantics=("parallel",),
            vmem_limit_bytes=_vmem_limit_bytes()),
    )(x2, p['w1'], p['b1'], p['w2'], p['b2'], gamma, beta)
    return out[:rows].reshape(B, L, D)


# --------------------------------------------------------------------------- #
# Parameter init (deterministic, synthetic).  All kernel-ready layouts / casts live here.
# --------------------------------------------------------------------------- #
def _linear_params(key, din, dout):
    kw, kb = jax.random.split(key)
    w = jax.random.normal(kw, (din, dout), jnp.float32) * (1.0 / math.sqrt(din))
    b = jax.random.normal(kb, (dout,), jnp.float32) * 0.01
    return w, b


def init_decoder_params(key, num_layers, vocab, max_len, d_model, num_heads, dff):
    dk = d_model // num_heads
    scale = 1.0 / math.sqrt(dk)
    bf = jnp.bfloat16

    k_emb, k_layers = jax.random.split(key)
    params = {'embedding': jax.random.normal(k_emb, (vocab, d_model), jnp.float32)}

    pos = jnp.arange(max_len, dtype=jnp.float32)[:, None]
    div = jnp.exp(jnp.arange(0, d_model, 2, dtype=jnp.float32)
                  * (-math.log(10000.0) / d_model))
    pe = jnp.zeros((max_len, d_model), jnp.float32)
    pe = pe.at[:, 0::2].set(jnp.sin(pos * div))
    pe = pe.at[:, 1::2].set(jnp.cos(pos * div))
    params['pe'] = pe

    def mha_params(k4):
        kq, kk, kv, ko = jax.random.split(k4, 4)
        wq, bq = _linear_params(kq, d_model, d_model)
        wk, bk = _linear_params(kk, d_model, d_model)
        wv, bv = _linear_params(kv, d_model, d_model)
        wo, bo = _linear_params(ko, d_model, d_model)
        # Hoisted kernel-ready layout: 1/sqrt(dk) folded into wq/bq, wk|wv concatenated into one
        # lane-dense (D, 2D) matrix, weights cast to bf16 once, biases kept f32 as (1, N) rows.
        return {'wq': (wq * scale).astype(bf),
                'bq': (bq * scale).reshape(1, d_model),
                'wkv': jnp.concatenate([wk, wv], axis=1).astype(bf),
                'bkv': jnp.concatenate([bk, bv]).reshape(1, 2 * d_model),
                'wo': wo.astype(bf),
                'bo': bo.reshape(1, d_model)}

    layers = []
    for lk in jax.random.split(k_layers, num_layers):
        ks = jax.random.split(lk, 4)
        w1, b1 = _linear_params(ks[2], d_model, dff)
        w2, b2 = _linear_params(ks[3], dff, d_model)
        layers.append({
            'self_mha': mha_params(ks[0]),
            'src_mha': mha_params(ks[1]),
            'ffn': {'w1': w1.astype(bf), 'b1': b1.reshape(1, dff),
                    'w2': w2.astype(bf), 'b2': b2.reshape(1, d_model)},
            'ln1_g': jnp.ones((1, d_model), jnp.float32),
            'ln1_b': jnp.zeros((1, d_model), jnp.float32),
            'ln2_g': jnp.ones((1, d_model), jnp.float32),
            'ln2_b': jnp.zeros((1, d_model), jnp.float32),
            'ln3_g': jnp.ones((1, d_model), jnp.float32),
            'ln3_b': jnp.zeros((1, d_model), jnp.float32),
        })
    params['layers'] = layers
    return params


# --------------------------------------------------------------------------- #
# Full Decoder forward: 3 fused pallas_calls per layer.
# --------------------------------------------------------------------------- #
def decoder_forward(params, tokens, memory, look_ahead_mask, trg_padding_mask,
                    *, d_model, num_heads):
    B, L = tokens.shape

    # Embedding gather + * sqrt(d_model) + positional encoding: left to XLA fusion
    # (a dedicated grid=(B,) Pallas kernel would add a full HBM round trip of x).
    emb = jnp.take(params['embedding'], tokens, axis=0)          # (B, L, D)
    x = emb * math.sqrt(d_model) + params['pe'][None, :L]

    # Pre-scaled additive mask biases (1 = masked -> -1e9), passed un-broadcast.
    la = look_ahead_mask.astype(jnp.float32)
    if la.ndim == 2:
        la = la[None]                                            # (1, L, L) shared over batch
    la_bias = la * -1e9
    pad = trg_padding_mask.astype(jnp.float32)
    if pad.ndim == 2:
        pad = pad[:, None, :]                                    # (B, 1, Lm)
    pad_bias = pad * -1e9

    memory = memory.astype(jnp.float32)
    for lp in params['layers']:
        x = attn_ln(x, x, la_bias, lp['self_mha'], lp['ln1_g'], lp['ln1_b'], num_heads)
        x = attn_ln(x, memory, pad_bias, lp['src_mha'], lp['ln2_g'], lp['ln2_b'], num_heads)
        x = ffn_ln(x, lp['ffn'], lp['ln3_g'], lp['ln3_b'])
    return x


if __name__ == "__main__":
    B, L, Lm = 2, 8, 8
    d_model, num_heads, dff = 32, 4, 64
    num_layers, vocab, max_len = 2, 20, 16

    key = jax.random.PRNGKey(0)
    kp, kt, km = jax.random.split(key, 3)
    params = init_decoder_params(kp, num_layers, vocab, max_len, d_model, num_heads, dff)

    tokens = jax.random.randint(kt, (B, L), 0, vocab)                       # int token ids
    memory = jax.random.normal(km, (B, Lm, d_model), jnp.float32)           # encoder output
    # Native (un-broadcast) mask shapes: causal (1, L, L), padding (B, 1, Lm). 1 = masked.
    look_ahead_mask = jnp.triu(jnp.ones((L, L), jnp.float32), k=1)[None]
    trg_padding_mask = jnp.zeros((B, 1, Lm), jnp.float32).at[1, 0, Lm - 2:].set(1.0)

    out = decoder_forward(params, tokens, memory, look_ahead_mask, trg_padding_mask,
                          d_model=d_model, num_heads=num_heads)
    out = jax.block_until_ready(out)

    assert out.shape == (B, L, d_model)
    assert bool(jnp.all(jnp.isfinite(out)))
    print("KERNEL_OK")
</pallas_src>

<mosaic_0001>
module attributes {stable_mosaic.version = 11 : i64} {
  func.func @attn_ln_kernel(%arg0: i32, %arg1: memref<1x8x32xf32, #tpu.memory_space<vmem>>, %arg2: memref<1x8x32xf32, #tpu.memory_space<vmem>>, %arg3: memref<1x8x8xf32, #tpu.memory_space<vmem>>, %arg4: memref<32x32xbf16, #tpu.memory_space<vmem>>, %arg5: memref<1x32xf32, #tpu.memory_space<vmem>>, %arg6: memref<32x64xbf16, #tpu.memory_space<vmem>>, %arg7: memref<1x64xf32, #tpu.memory_space<vmem>>, %arg8: memref<32x32xbf16, #tpu.memory_space<vmem>>, %arg9: memref<1x32xf32, #tpu.memory_space<vmem>>, %arg10: memref<1x32xf32, #tpu.memory_space<vmem>>, %arg11: memref<1x32xf32, #tpu.memory_space<vmem>>, %arg12: memref<1x8x32xf32, #tpu.memory_space<vmem>>) attributes {dimension_semantics = [#tpu.dimension_semantics<parallel>], iteration_bounds = array<i64: 2>, scalar_prefetch = 0 : i64, scratch_operands = 0 : i64, tpu.core_type = #tpu.core_type<tc>, window_params = [{transform_indices = @transform_0, window_bounds = array<i64: 1, 8, 32>}, {transform_indices = @transform_1, window_bounds = array<i64: 1, 8, 32>}, {pipeline_mode = #tpu.pipeline_mode<synchronous>, transform_indices = @transform_2, window_bounds = array<i64: 1, 8, 8>}, {pipeline_mode = #tpu.pipeline_mode<synchronous>, transform_indices = @transform_3, window_bounds = array<i64: 32, 32>}, {pipeline_mode = #tpu.pipeline_mode<synchronous>, transform_indices = @transform_4, window_bounds = array<i64: 1, 32>}, {pipeline_mode = #tpu.pipeline_mode<synchronous>, transform_indices = @transform_5, window_bounds = array<i64: 32, 64>}, {pipeline_mode = #tpu.pipeline_mode<synchronous>, transform_indices = @transform_6, window_bounds = array<i64: 1, 64>}, {pipeline_mode = #tpu.pipeline_mode<synchronous>, transform_indices = @transform_7, window_bounds = array<i64: 32, 32>}, {pipeline_mode = #tpu.pipeline_mode<synchronous>, transform_indices = @transform_8, window_bounds = array<i64: 1, 32>}, {pipeline_mode = #tpu.pipeline_mode<synchronous>, transform_indices = @transform_9, window_bounds = array<i64: 1, 32>}, {pipeline_mode = #tpu.pipeline_mode<synchronous>, transform_indices = @transform_10, window_bounds = array<i64: 1, 32>}, {transform_indices = @transform_11, window_bounds = array<i64: 1, 8, 32>}]} {
    %c0 = arith.constant 0 : index
    %c0_0 = arith.constant 0 : index
    %c0_1 = arith.constant 0 : index
    %0 = vector.load %arg1[%c0, %c0_0, %c0_1] : memref<1x8x32xf32, #tpu.memory_space<vmem>>, vector<1x8x32xf32>
    %1 = vector.shape_cast %0 : vector<1x8x32xf32> to vector<8x32xf32>
    %c0_2 = arith.constant 0 : index
    %c0_3 = arith.constant 0 : index
    %c0_4 = arith.constant 0 : index
    %2 = vector.load %arg2[%c0_2, %c0_3, %c0_4] : memref<1x8x32xf32, #tpu.memory_space<vmem>>, vector<1x8x32xf32>
    %3 = vector.shape_cast %2 : vector<1x8x32xf32> to vector<8x32xf32>
    %c0_5 = arith.constant 0 : index
    %c0_6 = arith.constant 0 : index
    %c0_7 = arith.constant 0 : index
    %4 = vector.load %arg3[%c0_5, %c0_6, %c0_7] : memref<1x8x8xf32, #tpu.memory_space<vmem>>, vector<1x8x8xf32>
    %5 = vector.shape_cast %4 : vector<1x8x8xf32> to vector<8x8xf32>
    %6 = arith.truncf %1 : vector<8x32xf32> to vector<8x32xbf16>
    %7 = arith.truncf %3 : vector<8x32xf32> to vector<8x32xbf16>
    %c0_8 = arith.constant 0 : index
    %c0_9 = arith.constant 0 : index
    %8 = vector.load %arg4[%c0_8, %c0_9] : memref<32x32xbf16, #tpu.memory_space<vmem>>, vector<32x32xbf16>
    %cst = arith.constant dense<0.000000e+00> : vector<8x32xf32>
    %9 = tpu.matmul %6, %8, %cst {dimension_numbers = #tpu.dot_dimension_numbers<[1], [0], [0], [1], [0, 0, 1, 1], [], []>} : vector<8x32xbf16>, vector<32x32xbf16>, vector<8x32xf32> -> vector<8x32xf32>
    %c0_10 = arith.constant 0 : index
    %c0_11 = arith.constant 0 : index
    %10 = vector.load %arg5[%c0_10, %c0_11] : memref<1x32xf32, #tpu.memory_space<vmem>>, vector<1x32xf32>
    %11 = vector.broadcast %10 : vector<1x32xf32> to vector<8x32xf32>
    %12 = arith.addf %9, %11 : vector<8x32xf32>
    %c0_12 = arith.constant 0 : index
    %c0_13 = arith.constant 0 : index
    %13 = vector.load %arg6[%c0_12, %c0_13] : memref<32x64xbf16, #tpu.memory_space<vmem>>, vector<32x64xbf16>
    %cst_14 = arith.constant dense<0.000000e+00> : vector<8x64xf32>
    %14 = tpu.matmul %7, %13, %cst_14 {dimension_numbers = #tpu.dot_dimension_numbers<[1], [0], [0], [1], [0, 0, 1, 1], [], []>} : vector<8x32xbf16>, vector<32x64xbf16>, vector<8x64xf32> -> vector<8x64xf32>
    %c0_15 = arith.constant 0 : index
    %c0_16 = arith.constant 0 : index
    %15 = vector.load %arg7[%c0_15, %c0_16] : memref<1x64xf32, #tpu.memory_space<vmem>>, vector<1x64xf32>
    %16 = vector.broadcast %15 : vector<1x64xf32> to vector<8x64xf32>
    %17 = arith.addf %14, %16 : vector<8x64xf32>
    %18 = vector.shape_cast %12 : vector<8x32xf32> to vector<8x4x8xf32>
    %19 = tpu.transpose %18, [1, 0, 2] : vector<8x4x8xf32> -> vector<4x8x8xf32>
    %20 = arith.truncf %19 : vector<4x8x8xf32> to vector<4x8x8xbf16>
    %21 = vector.extract_strided_slice %17 {offsets = [0, 0], sizes = [8, 32], strides = [1, 1]} : vector<8x64xf32> to vector<8x32xf32>
    %22 = vector.shape_cast %21 : vector<8x32xf32> to vector<8x4x8xf32>
    %23 = tpu.transpose %22, [1, 0, 2] : vector<8x4x8xf32> -> vector<4x8x8xf32>
    %24 = arith.truncf %23 : vector<4x8x8xf32> to vector<4x8x8xbf16>
    %25 = vector.extract_strided_slice %17 {offsets = [0, 32], sizes = [8, 32], strides = [1, 1]} : vector<8x64xf32> to vector<8x32xf32>
    %26 = vector.shape_cast %25 : vector<8x32xf32> to vector<8x4x8xf32>
    %27 = tpu.transpose %26, [1, 0, 2] : vector<8x4x8xf32> -> vector<4x8x8xf32>
    %28 = arith.truncf %27 : vector<4x8x8xf32> to vector<4x8x8xbf16>
    "tpu.trace_start"() <{level = 10 : i32, message = "hqd,hkd->hqk"}> : () -> ()
    %cst_17 = arith.constant dense<0.000000e+00> : vector<4x8x8xf32>
    %29 = tpu.matmul %20, %24, %cst_17 {dimension_numbers = #tpu.dot_dimension_numbers<[2], [2], [1], [1], [0, 0, 0, 1, 1, 1], [0], [0]>} : vector<4x8x8xbf16>, vector<4x8x8xbf16>, vector<4x8x8xf32> -> vector<4x8x8xf32>
    "tpu.trace_stop"() : () -> ()
    %30 = vector.shape_cast %5 : vector<8x8xf32> to vector<1x8x8xf32>
    %31 = vector.broadcast %30 : vector<1x8x8xf32> to vector<4x8x8xf32>
    %32 = arith.addf %29, %31 : vector<4x8x8xf32>
    %cst_18 = arith.constant dense<0xFF800000> : vector<4x8xf32>
    %33 = vector.multi_reduction <maximumf>, %32, %cst_18 [2] : vector<4x8x8xf32> to vector<4x8xf32>
    %34 = vector.shape_cast %33 : vector<4x8xf32> to vector<4x8x1xf32>
    %35 = vector.broadcast %34 : vector<4x8x1xf32> to vector<4x8x8xf32>
    %36 = arith.subf %32, %35 : vector<4x8x8xf32>
    %37 = math.exp %36 : vector<4x8x8xf32>
    %cst_19 = arith.constant dense<0.000000e+00> : vector<4x8xf32>
    %38 = vector.multi_reduction <add>, %37, %cst_19 [2] : vector<4x8x8xf32> to vector<4x8xf32>
    %39 = vector.shape_cast %38 : vector<4x8xf32> to vector<4x8x1xf32>
    %40 = tpu.reciprocal %39 {approx = true} : vector<4x8x1xf32> -> vector<4x8x1xf32>
    %41 = vector.broadcast %40 : vector<4x8x1xf32> to vector<4x8x8xf32>
    %42 = arith.mulf %37, %41 : vector<4x8x8xf32>
    %43 = arith.truncf %42 : vector<4x8x8xf32> to vector<4x8x8xbf16>
    "tpu.trace_start"() <{level = 10 : i32, message = "hqk,hkd->hqd"}> : () -> ()
    %cst_20 = arith.constant dense<0.000000e+00> : vector<4x8x8xf32>
    %44 = tpu.matmul %43, %28, %cst_20 {dimension_numbers = #tpu.dot_dimension_numbers<[2], [1], [1], [2], [0, 0, 0, 1, 1, 2], [0], [0]>} : vector<4x8x8xbf16>, vector<4x8x8xbf16>, vector<4x8x8xf32> -> vector<4x8x8xf32>
    "tpu.trace_stop"() : () -> ()
    %45 = tpu.transpose %44, [1, 0, 2] : vector<4x8x8xf32> -> vector<8x4x8xf32>
    %46 = vector.shape_cast %45 : vector<8x4x8xf32> to vector<8x32xf32>
    %47 = arith.truncf %46 : vector<8x32xf32> to vector<8x32xbf16>
    %c0_21 = arith.constant 0 : index
    %c0_22 = arith.constant 0 : index
    %48 = vector.load %arg8[%c0_21, %c0_22] : memref<32x32xbf16, #tpu.memory_space<vmem>>, vector<32x32xbf16>
    %cst_23 = arith.constant dense<0.000000e+00> : vector<8x32xf32>
    %49 = tpu.matmul %47, %48, %cst_23 {dimension_numbers = #tpu.dot_dimension_numbers<[1], [0], [0], [1], [0, 0, 1, 1], [], []>} : vector<8x32xbf16>, vector<32x32xbf16>, vector<8x32xf32> -> vector<8x32xf32>
    %c0_24 = arith.constant 0 : index
    %c0_25 = arith.constant 0 : index
    %50 = vector.load %arg9[%c0_24, %c0_25] : memref<1x32xf32, #tpu.memory_space<vmem>>, vector<1x32xf32>
    %51 = vector.broadcast %50 : vector<1x32xf32> to vector<8x32xf32>
    %52 = arith.addf %49, %51 : vector<8x32xf32>
    %53 = arith.addf %1, %52 : vector<8x32xf32>
    %cst_26 = arith.constant dense<0.000000e+00> : vector<8xf32>
    %54 = vector.multi_reduction <add>, %53, %cst_26 [1] : vector<8x32xf32> to vector<8xf32>
    %55 = vector.shape_cast %54 : vector<8xf32> to vector<8x1xf32>
    %cst_27 = arith.constant 3.200000e+01 : f32
    %56 = vector.broadcast %cst_27 : f32 to vector<8x1xf32>
    %57 = arith.divf %55, %56 : vector<8x1xf32>
    %58 = vector.broadcast %57 : vector<8x1xf32> to vector<8x32xf32>
    %59 = arith.subf %53, %58 : vector<8x32xf32>
    %60 = arith.mulf %59, %59 : vector<8x32xf32>
    %cst_28 = arith.constant dense<0.000000e+00> : vector<8xf32>
    %61 = vector.multi_reduction <add>, %60, %cst_28 [1] : vector<8x32xf32> to vector<8xf32>
    %62 = vector.shape_cast %61 : vector<8xf32> to vector<8x1xf32>
    %cst_29 = arith.constant 3.200000e+01 : f32
    %63 = vector.broadcast %cst_29 : f32 to vector<8x1xf32>
    %64 = arith.divf %62, %63 : vector<8x1xf32>
    %cst_30 = arith.constant 9.99999997E-7 : f32
    %65 = vector.broadcast %cst_30 : f32 to vector<8x1xf32>
    %66 = arith.addf %64, %65 : vector<8x1xf32>
    %67 = math.rsqrt %66 : vector<8x1xf32>
    %68 = vector.broadcast %67 : vector<8x1xf32> to vector<8x32xf32>
    %69 = arith.mulf %59, %68 : vector<8x32xf32>
    %c0_31 = arith.constant 0 : index
    %c0_32 = arith.constant 0 : index
    %70 = vector.load %arg10[%c0_31, %c0_32] : memref<1x32xf32, #tpu.memory_space<vmem>>, vector<1x32xf32>
    %71 = vector.broadcast %70 : vector<1x32xf32> to vector<8x32xf32>
    %72 = arith.mulf %69, %71 : vector<8x32xf32>
    %c0_33 = arith.constant 0 : index
    %c0_34 = arith.constant 0 : index
    %73 = vector.load %arg11[%c0_33, %c0_34] : memref<1x32xf32, #tpu.memory_space<vmem>>, vector<1x32xf32>
    %74 = vector.broadcast %73 : vector<1x32xf32> to vector<8x32xf32>
    %75 = arith.addf %72, %74 : vector<8x32xf32>
    %c0_35 = arith.constant 0 : index
    %c0_36 = arith.constant 0 : index
    %c0_37 = arith.constant 0 : index
    %76 = vector.load %arg12[%c0_35, %c0_36, %c0_37] : memref<1x8x32xf32, #tpu.memory_space<vmem>>, vector<1x8x32xf32>
    %77 = vector.shape_cast %76 : vector<1x8x32xf32> to vector<8x32xf32>
    %78 = vector.shape_cast %75 : vector<8x32xf32> to vector<1x8x32xf32>
    tpu.vector_store %arg12[%c0_35, %c0_36, %c0_37], %78 {strides = array<i32>} : memref<1x8x32xf32, #tpu.memory_space<vmem>>, vector<1x8x32xf32>,
    return
  }
  func.func @transform_0(%arg0: i32) -> (i32, i32, i32) {
    %c0_i32 = arith.constant 0 : i32
    %c0_i32_0 = arith.constant 0 : i32
    %c0_i32_1 = arith.constant 0 : i32
    return %arg0, %c0_i32, %c0_i32_0 : i32, i32, i32
  }
  func.func @transform_1(%arg0: i32) -> (i32, i32, i32) {
    %c0_i32 = arith.constant 0 : i32
    %c0_i32_0 = arith.constant 0 : i32
    %c0_i32_1 = arith.constant 0 : i32
    return %arg0, %c0_i32, %c0_i32_0 : i32, i32, i32
  }
  func.func @transform_2(%arg0: i32) -> (i32, i32, i32) {
    %c0_i32 = arith.constant 0 : i32
    %c0_i32_0 = arith.constant 0 : i32
    %c0_i32_1 = arith.constant 0 : i32
    %c0_i32_2 = arith.constant 0 : i32
    return %c0_i32, %c0_i32_0, %c0_i32_1 : i32, i32, i32
  }
  func.func @transform_3(%arg0: i32) -> (i32, i32) {
    %c0_i32 = arith.constant 0 : i32
    %c0_i32_0 = arith.constant 0 : i32
    %c0_i32_1 = arith.constant 0 : i32
    return %c0_i32, %c0_i32_0 : i32, i32
  }
  func.func @transform_4(%arg0: i32) -> (i32, i32) {
    %c0_i32 = arith.constant 0 : i32
    %c0_i32_0 = arith.constant 0 : i32
    %c0_i32_1 = arith.constant 0 : i32
    return %c0_i32, %c0_i32_0 : i32, i32
  }
  func.func @transform_5(%arg0: i32) -> (i32, i32) {
    %c0_i32 = arith.constant 0 : i32
    %c0_i32_0 = arith.constant 0 : i32
    %c0_i32_1 = arith.constant 0 : i32
    return %c0_i32, %c0_i32_0 : i32, i32
  }
  func.func @transform_6(%arg0: i32) -> (i32, i32) {
    %c0_i32 = arith.constant 0 : i32
    %c0_i32_0 = arith.constant 0 : i32
    %c0_i32_1 = arith.constant 0 : i32
    return %c0_i32, %c0_i32_0 : i32, i32
  }
  func.func @transform_7(%arg0: i32) -> (i32, i32) {
    %c0_i32 = arith.constant 0 : i32
    %c0_i32_0 = arith.constant 0 : i32
    %c0_i32_1 = arith.constant 0 : i32
    return %c0_i32, %c0_i32_0 : i32, i32
  }
  func.func @transform_8(%arg0: i32) -> (i32, i32) {
    %c0_i32 = arith.constant 0 : i32
    %c0_i32_0 = arith.constant 0 : i32
    %c0_i32_1 = arith.constant 0 : i32
    return %c0_i32, %c0_i32_0 : i32, i32
  }
  func.func @transform_9(%arg0: i32) -> (i32, i32) {
    %c0_i32 = arith.constant 0 : i32
    %c0_i32_0 = arith.constant 0 : i32
    %c0_i32_1 = arith.constant 0 : i32
    return %c0_i32, %c0_i32_0 : i32, i32
  }
  func.func @transform_10(%arg0: i32) -> (i32, i32) {
    %c0_i32 = arith.constant 0 : i32
    %c0_i32_0 = arith.constant 0 : i32
    %c0_i32_1 = arith.constant 0 : i32
    return %c0_i32, %c0_i32_0 : i32, i32
  }
  func.func @transform_11(%arg0: i32) -> (i32, i32, i32) {
    %c0_i32 = arith.constant 0 : i32
    %c0_i32_0 = arith.constant 0 : i32
    %c0_i32_1 = arith.constant 0 : i32
    return %arg0, %c0_i32, %c0_i32_0 : i32, i32, i32
  }
}

</mosaic_0001>

<bundles_post_ra>
// kernel: tpu_custom_call.1
= control target key start
LH: loop header
LB: loop body
LE: loop exit
PB: predicated region body
PF: predicated region fallthrough
CT: control target
= control target key end

     0   :  { %s2932_s0 = inlined_call_operand.hbm [shape: f32[2,8,32], index: 0, kind: input, shape index: {}]   ;;  %s2933_s1 = inlined_call_operand.hbm [shape: f32[2,8,32], index: 1, kind: input, shape index: {}]   ;;  %s2934_s2 = inlined_call_operand.hbm [shape: f32[1,8,8], index: 2, kind: input, shape index: {}]   ;;  %s2935_s3 = inlined_call_operand.hbm [shape: bf16[32,32], index: 3, kind: input, shape index: {}]   ;;  %s2936_s4 = inlined_call_operand.vmem [shape: f32[1,32], index: 4, kind: input, shape index: {}]   ;;  %s2937_s5 = inlined_call_operand.vmem [shape: bf16[32,64], index: 5, kind: input, shape index: {}]   ;;  %s2938_s6 = inlined_call_operand.vmem [shape: f32[1,64], index: 6, kind: input, shape index: {}]   ;;  %s2939_s7 = inlined_call_operand.hbm [shape: bf16[32,32], index: 7, kind: input, shape index: {}]   ;;  %s2940_s8 = inlined_call_operand.vmem [shape: f32[1,32], index: 8, kind: input, shape index: {}]   ;;  %s2941_s9 = inlined_call_operand.vmem [shape: f32[1,32], index: 9, kind: input, shape index: {}]   ;;  %s2942_s10 = inlined_call_operand.vmem [shape: f32[1,32], index: 10, kind: input, shape index: {}]   ;;  %s2943_s11 = inlined_call_operand.hbm [shape: f32[2,8,32], index: 11, kind: output, shape index: {}]  }
   0x1   :  { %2952 = sst [smem:[#allocation21_spill]] %s2934_s2 }
   0x2   :  { %2953 = sst [smem:[#allocation22_spill]] %s2935_s3 }
   0x3   :  { %2954 = sst [smem:[#allocation23_spill]] %s2939_s7 }
   0x4   :  { %2955 = sst [smem:[#allocation24_spill]] %s2943_s11 }
   0x5   :  { %16 = vsyncpa [#allocation3], 0 }
   0x6   :  { %18 = vsyncpa [#allocation3 + $0x1], 0 }
   0x7   :  { %19 = vsyncpa [#allocation6], 0 }
   0x8   :  { %21 = vsyncpa [#allocation6 + $0x1], 0 }
   0x9   :  { %22 = vsyncpa [#allocation9], 0 }
   0xa   :  { %23 = vsyncpa [#allocation4], 0 }
   0xb   :  { %25 = vsyncpa [#allocation4 + $0x1], 0  ;;  %s2446_s17 = smov 0   ;;  %s2448_s18 = smov 0  }
   0xc   :  { %s2450_s19 = smov 0   ;;  %s2452_s20 = smov 0  }
   0xd LB: > { %2956 = sst [smem:[#allocation17_spill]] %s2353_s17  ;;  %s2467_s21 = sadd.s32 4294967295, %s2365_s20   ;;  %s2365_s20 = sphi %s2452_s20, %s2988_s20   ;;  %s2361_s19 = sphi %s2450_s19, %s2985_s19   ;;  %s2357_s18 = sphi %s2448_s18, %s2987_s18   ;;  %s2353_s17 = sphi %s2446_s17, %s2986_s17  }
   0xe   : > { %2957 = sst [smem:[#allocation18_spill]] %s2361_s19  ;;  %s1876_s22 = sadd.s32 4294967294, %s2365_s20  }
   0xf   : > { %p51_p0 = scmp.ne.s32.totalorder %s2357_s18, %s2353_s17  ;;  %p2945_p1 = scmp.eq.s32.totalorder %s2467_s21, 0 }
  0x10   : > { %p296_p3 = scmp.eq.s32.totalorder %s1876_s22, 1  ;;  %p1877_p5 = scmp.ge.s32.totalorder %s2365_s20, 1 }
  0x11   : > { %p2476_p4 = por %p2945_p1, %p51_p0  ;;  %p303_p7 = scmp.lt.s32.totalorder %s2365_s20, 3 }
  0x12   : > { %p2481_p6 = por %p296_p3, %p51_p0  ;;  %s2367_s26 = smov [#allocation7]  }
  0x13   : > { %s2958_s23 = scalar_select %p2476_p4, 1, 0 }
  0x14   : > { %s2959_s24 = scalar_select %p2481_p6, 1, 0 }
  0x15   : > { %p2486_p8 = pnand %p1877_p5, %p303_p7  ;;  %s316_s27 = sshll.u32 %s2367_s26, 4  ;;  %s317_s27 = int_to_ptr.vmem [resolvable:$true] %s316_s27 }
  0x16   : > { %2960 = sst [smem:[#allocation19_spill]] %s2959_s24  ;;  %s2368_s28 = smov [#allocation8]  }
  0x17   : > { %s2961_s25 = scalar_select %p2486_p8, 1, 0 }
  0x18   : > { %p2042_p10 = pneg %p2486_p8  ;;  %s326_s29 = sshll.u32 %s2368_s28, 4  ;;  %s2499_s29 = int_to_ptr.vmem [resolvable:$true] %s326_s29 }
  0x19   : > { %s2369_s12 = smov [#allocation10]   ;;  %s2963_s2 = sld [smem:[#allocation21_spill]] }
  0x1a   : > { %p2495_p11 = pnand %p2042_p10, %p2945_p1  ;;  %s2501_s13 = sshll.u32 %s2369_s12, 4  ;;  %s349_s13 = int_to_ptr.vmem [resolvable:$true] %s2501_s13 }
  0x1c   : > { %p2511_p13 = pneg %p2495_p11 }
  0x1f   : > { %s2143_s16 = scalar_lea.hbm %s2963_s2, 128 }
  0x20   : > { %p2144_p12 = scmp.ne.s32.totalorder %s2963_s2, %s2143_s16  ;;  %p2150_p5 = scmp.lt.u32.totalorder %s2143_s16, %s2963_s2 }
  0x22   : > { %p2146_p0 = pnand %p2511_p13, %p2144_p12 }
  0x24   : > { %p2147_p3 = pneg %p2146_p0 }
  0x26   : > { %p2152_p7 = pnand %p2150_p5, %p2147_p3 }
  0x28   : > { %2155 = shalt.err (!%p2152_p7)
}
  0x29   : > { %s2156_s14 = scalar_lea.vmem %s317_s27, 128  ;;  %p2164_p2 = scmp.lt.s32.totalorder %s317_s27, %s317_s27 }
  0x2a   : > { %p2157_p10 = scmp.ne.s32.totalorder %s317_s27, %s2156_s14  ;;  %p2165_p6 = scmp.lt.s32.totalorder %s2156_s14, %s2156_s14 }
  0x2c   : > { %p2159_p9 = pnand %p2157_p10, %p2511_p13  ;;  %p2166_p4 = por %p2165_p6, %p2164_p2 }
  0x2e   : > { %p2160_p1 = pneg %p2159_p9 }
  0x30   : > { %p2167_p8 = pnand %p2166_p4, %p2160_p1 }
  0x32   : > { %2170 = shalt.err (!%p2167_p8)
}
  0x33   : > { %2045 = dma.hbm_to_vmem [thread:$0]  (!%p2495_p11), %s2963_s2, 128, %s317_s27, [#allocation6]  }
  0x34   : > { %s2965_s3 = sld [smem:[#allocation22_spill]] }
  0x3a   : > { %s2171_s26 = scalar_lea.hbm %s2965_s3, 256 }
  0x3b   : > { %p2172_p9 = scmp.ne.s32.totalorder %s2965_s3, %s2171_s26  ;;  %p2178_p1 = scmp.lt.u32.totalorder %s2171_s26, %s2965_s3 }
  0x3d   : > { %p2174_p12 = pnand %p2172_p9, %p2511_p13 }
  0x3f   : > { %p2175_p2 = pneg %p2174_p12 }
  0x41   : > { %p2180_p4 = pnand %p2178_p1, %p2175_p2 }
  0x43   : > { %2183 = shalt.err (!%p2180_p4)
}
  0x44   : > { %s2184_s27 = scalar_lea.vmem %s2499_s29, 256  ;;  %p2192_p3 = scmp.lt.s32.totalorder %s2499_s29, %s2499_s29 }
  0x45   : > { %p2185_p6 = scmp.ne.s32.totalorder %s2499_s29, %s2184_s27  ;;  %p2193_p5 = scmp.lt.s32.totalorder %s2184_s27, %s2184_s27 }
  0x47   : > { %p2187_p8 = pnand %p2185_p6, %p2511_p13  ;;  %p2194_p7 = por %p2193_p5, %p2192_p3 }
  0x49   : > { %p2188_p0 = pneg %p2187_p8 }
  0x4b   : > { %p2195_p10 = pnand %p2194_p7, %p2188_p0 }
  0x4d   : > { %2198 = shalt.err (!%p2195_p10)
}
  0x4e   : > { %s2370_s17 = smov 64   ;;  %s2371_s11 = smov 4  }
  0x4f   : > { %2048 = dma.hbm_to_vmem [thread:$0]  (!%p2495_p11), %s2965_s3, 256, %s2499_s29, [#allocation9], %s2370_s17, %s2370_s17, %s2371_s11  }
  0x50   : > { %s2966_s7 = sld [smem:[#allocation23_spill]] }
  0x56   : > { %s2199_s26 = scalar_lea.hbm %s2966_s7, 256 }
  0x57   : > { %p2200_p9 = scmp.ne.s32.totalorder %s2966_s7, %s2199_s26  ;;  %p2206_p1 = scmp.lt.u32.totalorder %s2199_s26, %s2966_s7 }
  0x59   : > { %p2202_p12 = pnand %p2200_p9, %p2511_p13 }
  0x5b   : > { %p2203_p2 = pneg %p2202_p12 }
  0x5d   : > { %p2208_p4 = pnand %p2206_p1, %p2203_p2 }
  0x5f   : > { %2211 = shalt.err (!%p2208_p4)
}
  0x60   : > { %s2212_s15 = scalar_lea.vmem %s349_s13, 256  ;;  %p2220_p3 = scmp.lt.s32.totalorder %s349_s13, %s349_s13 }
  0x61   : > { %p2213_p6 = scmp.ne.s32.totalorder %s349_s13, %s2212_s15  ;;  %p2221_p5 = scmp.lt.s32.totalorder %s2212_s15, %s2212_s15 }
  0x63   : > { %p2215_p8 = pnand %p2213_p6, %p2511_p13  ;;  %p2222_p7 = por %p2221_p5, %p2220_p3 }
  0x65   : > { %p2216_p0 = pneg %p2215_p8 }
  0x67   : > { %p2223_p10 = pnand %p2222_p7, %p2216_p0 }
  0x69   : > { %2226 = shalt.err (!%p2223_p10)
}
  0x6a   : > { %2051 = dma.hbm_to_vmem [thread:$0]  (!%p2495_p11), %s2966_s7, 256, %s349_s13, [#allocation9], %s2370_s17, %s2370_s17, %s2371_s11  }
  0x6b   : > { %s2570_s2 = sadd.s32 1, %s2365_s20   ;;  %s38_s30 = sadd.s32 1, %s2361_s19 }
  0x6c   : > { %s35_s28 = ssub.s32 %s2365_s20, %s2570_s2  ;;  %p45_p9 = scmp.ne.s32.totalorder %s2361_s19, %s2357_s18 }
  0x6d   : > { %p36_p13 = scmp.eq.s32.totalorder %s35_s28, 0  ;;  %p46_p12 = scmp.eq.s32.totalorder %s2365_s20, 0 }
  0x6e   : > { %p2066_p2 = scmp.lt.s32.totalorder %s2365_s20, 2  ;;  %p2968_p4 = scmp.eq.s32.totalorder %s2467_s21, 1 }
  0x6f   : > { %s2580_s24 = scalar_select %p36_p13, %s2361_s19, %s38_s30  }
  0x70   : > { %p47_p1 = por %p46_p12, %p45_p9  ;;  %p2584_p6 = por %p2968_p4, %p45_p9 }
  0x71   : > { %2967 = sst [smem:[#allocation20_spill]] %s2580_s24  ;;  %s371_s26 = sand.u32 1, %s2361_s19  }
  0x72   : > { %s2969_s16 = scalar_select %p2584_p6, 1, 0 }
  0x73   : > { %s1883_s12 = sshll.u32 %s2365_s20, 7  ;;  %s2590_s13 = sshll.u32 %s371_s26, 3 }
  0x74   : > { %s2595_s14 = scalar_lea.hbm %s2932_s0, %s1883_s12  ;;  %s375_s27 = scalar_lea.vmem [#allocation2], %s2590_s13 }
  0x75   : > { %s382_s15 = sshll.u32 %s375_s27, 4  ;;  %p2598_p11 = pnand %p2066_p2, %p47_p1  ;;  %s2602_s15 = int_to_ptr.vmem [resolvable:$true] %s382_s15 }
  0x76   : > { %s2607_s30 = scalar_lea.hbm %s2933_s1, %s1883_s12  ;;  %s372_s17 = scalar_lea.sflag [#allocation3], %s371_s26 }
  0x77   : > { %s2227_s11 = scalar_lea.hbm %s2595_s14, 128  ;;  %p2229_p0 = pneg %p2598_p11 }
  0x78   : > { %p2228_p8 = scmp.ne.s32.totalorder %s2595_s14, %s2227_s11  ;;  %s2232_s7 = scalar_lea.hbm %s2932_s0, 256 }
  0x79   : > { %p2233_p7 = scmp.lt.u32.totalorder %s2595_s14, %s2932_s0  ;;  %p2234_p10 = scmp.lt.u32.totalorder %s2232_s7, %s2227_s11 }
  0x7a   : > { %p2230_p3 = pnand %p2229_p0, %p2228_p8  ;;  %p2236_p9 = scmp.lt.u32.totalorder %s2227_s11, %s2595_s14 }
  0x7b   : > { %p2235_p13 = por %p2234_p10, %p2233_p7 }
  0x7c   : > { %p2231_p5 = pneg %p2230_p3 }
  0x7d   : > { %p2237_p12 = por %p2236_p9, %p2235_p13 }
  0x7f   : > { %p2238_p2 = pnand %p2237_p12, %p2231_p5 }
  0x81   : > { %2241 = shalt.err (!%p2238_p2)
}
  0x82   : > { %s2242_s26 = scalar_lea.vmem %s2602_s15, 128  ;;  %s2372_s3 = smov [#allocation2]  }
  0x83   : > { %p2243_p1 = scmp.ne.s32.totalorder %s2602_s15, %s2242_s26  ;;  %s2247_s12 = sshll.u32 %s2372_s3, 4  ;;  %s2248_s12 = int_to_ptr.vmem [resolvable:$false] %s2247_s12 }
  0x84   : > { %s2249_s19 = scalar_lea.vmem %s2248_s12, 256  ;;  %p2250_p3 = scmp.lt.s32.totalorder %s2602_s15, %s2248_s12 }
  0x85   : > { %p2245_p4 = pnand %p2243_p1, %p2229_p0  ;;  %p2251_p7 = scmp.lt.s32.totalorder %s2249_s19, %s2242_s26 }
  0x87   : > { %p2246_p8 = pneg %p2245_p4  ;;  %p2252_p10 = por %p2251_p7, %p2250_p3 }
  0x89   : > { %p2253_p13 = pnand %p2252_p10, %p2246_p8 }
  0x8b   : > { %2256 = shalt.err (!%p2253_p13)
}
  0x8c   : > { %2055 = dma.hbm_to_vmem [thread:$0]  (!%p2598_p11), %s2595_s14, 128, %s2602_s15, %s372_s17  }
  0x8d   : > { %s389_s7 = sand.u32 1, %s2365_s20   ;;  %s393_s24 = scalar_lea.vmem [#allocation5], %s2590_s13 }
  0x8e   : > { %s400_s22 = sshll.u32 %s393_s24, 4  ;;  %s390_s28 = scalar_lea.sflag [#allocation6], %s389_s7  ;;  %s401_s22 = int_to_ptr.vmem [resolvable:$true] %s400_s22 }
  0x8f   : > { %s2257_s11 = scalar_lea.hbm %s2607_s30, 128  ;;  %s2262_s3 = scalar_lea.hbm %s2933_s1, 256 }
  0x90   : > { %p2258_p5 = scmp.ne.s32.totalorder %s2607_s30, %s2257_s11  ;;  %p2263_p2 = scmp.lt.u32.totalorder %s2607_s30, %s2933_s1 }
  0x91   : > { %p2264_p1 = scmp.lt.u32.totalorder %s2262_s3, %s2257_s11  ;;  %p2266_p8 = scmp.lt.u32.totalorder %s2257_s11, %s2607_s30 }
  0x92   : > { %p2260_p9 = pnand %p2258_p5, %p2229_p0 }
  0x93   : > { %p2265_p4 = por %p2264_p1, %p2263_p2 }
  0x94   : > { %p2261_p12 = pneg %p2260_p9 }
  0x95   : > { %p2267_p3 = por %p2266_p8, %p2265_p4 }
  0x97   : > { %p2268_p7 = pnand %p2267_p3, %p2261_p12 }
  0x99   : > { %2271 = shalt.err (!%p2268_p7)
}
  0x9a   : > { %s2272_s13 = scalar_lea.vmem %s401_s22, 128  ;;  %s2373_s14 = smov [#allocation5]  }
  0x9b   : > { %p2273_p10 = scmp.ne.s32.totalorder %s401_s22, %s2272_s13  ;;  %s2277_s15 = sshll.u32 %s2373_s14, 4  ;;  %s2278_s15 = int_to_ptr.vmem [resolvable:$false] %s2277_s15 }
  0x9c   : > { %s2279_s17 = scalar_lea.vmem %s2278_s15, 256  ;;  %p2280_p9 = scmp.lt.s32.totalorder %s401_s22, %s2278_s15 }
  0x9d   : > { %p2275_p13 = pnand %p2273_p10, %p2229_p0  ;;  %p2281_p6 = scmp.lt.s32.totalorder %s2279_s17, %s2272_s13 }
  0x9f   : > { %p2276_p5 = pneg %p2275_p13  ;;  %p2282_p1 = por %p2281_p6, %p2280_p9 }
  0xa1   : > { %p2283_p2 = pnand %p2282_p1, %p2276_p5 }
  0xa3   : > { %2286 = shalt.err (!%p2283_p2)
}
  0xa4   : > { %2058 = dma.hbm_to_vmem [thread:$0]  (!%p2598_p11), %s2607_s30, 128, %s401_s22, %s390_s28  }
  0xa5   : > { %p2971_p12 = scmp.ne.s32.totalorder %s2961_s25, 0 }
  0xa6   : > { %s2658_s7 = sand.u32 (!%p2971_p12), 1, %s2357_s18   ;;  %p2972_p6 = scmp.ne.s32.totalorder (!%p2971_p12), %s2958_s23, 0 }
  0xa7   : > { %409 = sbr.rel (%p2971_p12) target bundleno = 2039 (0x7f7), region = 64  ;;  %s2661_s24 = sshll.u32 (!%p2971_p12), %s2658_s7, 3 }
  0xa8   : > { %s412_s11 = scalar_lea.sflag (!%p2971_p12), [#allocation3], %s2658_s7  ;;  %s415_s27 = scalar_lea.vmem (!%p2971_p12), [#allocation2], %s2661_s24 }
  0xae   : > { %2332 = dma.done.wait (%p2972_p6), %s412_s11, 128  }
  0xaf   : > { %2334 = vsyncadd (%p2972_p6), %s412_s11, 4294967168  ;;  %s420_s25 = sand.u32 1, %s2467_s21   ;;  %s424_s30 = scalar_lea.vmem [#allocation5], %s2661_s24 }
  0xb0   : > { %s421_s29 = scalar_lea.sflag [#allocation6], %s420_s25 }
  0xb1   : > { %2336 = dma.done.wait (%p2972_p6), %s421_s29, 128  }
  0xb2   : > { %2338 = vsyncadd (%p2972_p6), %s421_s29, 4294967168  ;;  %p2973_p11 = scmp.eq.s32.totalorder %s2467_s21, 0 }
  0xb4   : > { %2340 = dma.done.wait (%p2973_p11), [#allocation6], 128   ;;  %p2974_p0 = pmov %p2973_p11 }
  0xb6   : > { %2342 = vsyncadd (%p2974_p0), [#allocation6], 4294967168  ;;  %p2975_p4 = pmov %p2974_p0 }
  0xb7   : > { %p2976_p8 = pmov %p2974_p0 }
  0xb8   : > { %2344 = dma.done.wait (%p2975_p4), [#allocation9], 512  }
  0xb9   : > { %2346 = vsyncadd (%p2976_p8), [#allocation9], 4294966784  ;;  %v2374_v0 = vmov 0.0   ;;  %vm2375_vm0 = vmmov 0   ;;  %v2119_v1 = vld [vmem:[%s2937_s5] sm:$0xff]   ;;  %v2120_v2 = vld [vmem:[#allocation8] sm:$0xff]   ;;  %v634_v23 = vlaneseq }
  0xba   : > { %1960 = vmatprep.subr.bf16.mxu1 %v2374_v0  ;;  %1952 = vmatprep.subr.bf16.mxu0 %v2374_v0  ;;  %v2121_v3 = vld [vmem:[%s2937_s5 + $0x8] sm:$0xff]   ;;  %v482_v4 = vld [vmem:[%s424_s30] sm:$0xff]  ;;  %vm509_vm1 = vcmask 261120   ;;  %v1897_v9 = vld [vmem:[%s2938_s6] ss:$0 sm:$0xff]  ;;  %s2376_s14 = smov 104  }
  0xbb   : > { %1964 = vmatprep.mubr.msk.bf16.mxu1 %vm2375_vm0, %v2374_v0  ;;  %1956 = vmatprep.mubr.msk.bf16.mxu0 %vm2375_vm0, %v2374_v0  ;;  %v2122_v5 = vld [vmem:[#allocation8 + $0x8] sm:$0xff]   ;;  %v2697_v6 = vld [vmem:[%s415_s27] sm:$0xff]  ;;  %v485_v7 = vpack.c.bf16 %v482_v4, %v482_v4  ;;  %s2377_s15 = smov 120   ;;  %s2378_s17 = smov 112   ;;  %v2379_v21 = vmov 1983009808  }
  0xbc   : > { %1961 = vmatpush3.bf16.msra.mxu1 %v2119_v1  ;;  %1953 = vmatpush3.bf16.msra.mxu0 %v2120_v2  ;;  %v484_v8 = vpack.c.bf16 %v2697_v6, %v2697_v6  ;;  %v1893_v11 = vld [vmem:[%s2936_s4] ss:$0 sm:$0xff]  ;;  %v632_v22 = vunpack.c.l.s4 %v2379_v21  ;;  %v2380_v24 = vmov 1934713408   ;;  %v635_v27 = vshrl.u32 %v634_v23, 7  ;;  %s2381_s11 = smov 96  }
  0xbd   : > { %1962 = vmatprep.subr.bf16.mxu1 %v2374_v0  ;;  %1954 = vmatprep.subr.bf16.mxu0 %v2374_v0  ;;  %v664_v25 = vunpack.c.l.s4 %v2380_v24  ;;  %vm1071_vm2 = vcmask 64512   ;;  %vm1307_vm3 = vcmask 1043456   ;;  %s2382_s27 = smov 16   ;;  %s2383_s25 = smov 8   ;;  %vm1638_vm4 = vcmask 130048  }
  0xbe   : > { %v633_v26 = vunpack.c.0.s8 %v632_v22  ;;  %s2384_s29 = smov 24   ;;  %vm1640_vm5 = vcmask 195584   ;;  %s1924_s12 = sshll.u32 %s2467_s21, 7 }
  0xbf   : > { %v665_v30 = vunpack.c.0.s8 %v664_v25  ;;  %s479_s19 = scalar_lea.vmem [#allocation11], %s2661_s24  ;;  %p2979_p7 = scmp.ne.s32.totalorder %s2969_s16, 0 }
  0xc0   : > { %1963 = vmatpush3.bf16.msra.mxu1 %v2121_v3  ;;  %1955 = vmatpush3.bf16.msra.mxu0 %v2122_v5  ;;  %v2724_v31 = vsub.s32 %v633_v26, %v635_v27  ;;  %s1755_s13 = sshll.u32 %s479_s19, 4  ;;  %s2385_s21 = smov [#allocation11]   ;;  %s2889_s13 = int_to_ptr.vmem [resolvable:$true] %s1755_s13 }
  0xc1   : > { %1974 = vmatprep.subr.bf16.mxu1 %v2374_v0  ;;  %1968 = vmatprep.subr.bf16.mxu0 %v2374_v0  ;;  %v2736_v38 = vsub.s32 %v665_v30, %v635_v27  ;;  %s2291_s24 = sshll.u32 %s2385_s21, 4  ;;  %s2292_s24 = int_to_ptr.vmem [resolvable:$false] %s2291_s24 }
  0xc2   : > { %s2293_s30 = scalar_lea.vmem %s2292_s24, 256  ;;  %p2294_p5 = scmp.lt.s32.totalorder %s2889_s13, %s2292_s24 }
  0xc3   : > { %1965 = vmatmul.mubr.msk.bf16.vlgmr.msra.gmra.mrb[0].mxu1 %vm509_vm1, %v485_v7  ;;  %1957 = vmatmul.mubr.msk.bf16.vlgmr.msra.gmra.mrb[0].mxu0 %vm509_vm1, %v484_v8 }
  0xc4   : > { %1976 = vmatprep.mubr.msk.bf16.mxu1 %vm2375_vm0, %v2374_v0  ;;  %1970 = vmatprep.mubr.msk.bf16.mxu0 %vm2375_vm0, %v2374_v0 }
 0x196   : > { %v613_v10 = vpop.f32.mrb[0].mxu1  ;;  %v547_v14 = vpop.f32.mrb[0].mxu0 }
 0x197   : > { %v2715_v12 = vadd.f32 %v1897_v9, %v613_v10  ;;  %v1966_v13 = vpop.f32.mrb[1].mxu1  ;;  %v1958_v16 = vpop.f32.mrb[1].mxu0  ;;  %v548_v18 = vadd.f32 %v1893_v11, %v547_v14 }
 0x198   : > { %v616_v15 = vpop.f32.mrb[2].mxu1  ;;  %v550_v19 = vpop.f32.mrb[2].mxu0 }
 0x199   : > { %776 = vrot.lane.b32.xlu1 %v2715_v12, %s2376_s14  ;;  %770 = vrot.lane.b32.xlu0 %v2715_v12, %s2377_s15  ;;  %v1967_v17 = vpop.f32.mrb[3].mxu1  ;;  %v1959_v20 = vpop.f32.mrb[3].mxu0 }
 0x19d   : > { %773 = vrot.lane.b32.xlu0 %v2715_v12, %s2378_s17  ;;  %620 = vrot.lane.b32.xlu1 %v548_v18, %s2377_s15 }
 0x1a1   : > { %623 = vrot.lane.b32.xlu0 %v548_v18, %s2378_s17  ;;  %626 = vrot.lane.b32.xlu1 %v548_v18, %s2376_s14  ;;  %s2977_s17 = sld [smem:[#allocation24_spill]] }
 0x20b   : > { %v2720_v28 = vpop.permute.xlu1 %776  ;;  %v2722_v29 = vpop.permute.xlu0 %770 }
 0x20c   : > { %v795_v32 = vcombine.low %v2722_v29, %v2720_v28  ;;  %v796_v33 = vcombine.high %v2722_v29, %v2720_v28 }
 0x20e   : > { %v803_v39 = vrot.slane %v795_v32, %v2724_v31  ;;  %v810_v40 = vrot.slane %v796_v33, %v2724_v31 }
 0x20f   : > { %v2730_v34 = vpop.permute.xlu0 %773  ;;  %v621_v35 = vpop.permute.xlu1 %620 }
 0x210   : > { %v779_v36 = vcombine.low %v2715_v12, %v2730_v34  ;;  %v780_v37 = vcombine.high %v2715_v12, %v2730_v34 }
 0x212   : > { %v787_v41 = vrot.slane %v779_v36, %v2724_v31  ;;  %v794_v42 = vrot.slane %v780_v37, %v2724_v31 }
 0x213   : > { %v624_v43 = vpop.permute.xlu0 %623  ;;  %v627_v44 = vpop.permute.xlu1 %626 }
 0x214   : > { %v811_v45 = vcombine.low %v787_v41, %v803_v39  ;;  %v812_v46 = vcombine.high %v787_v41, %v803_v39  ;;  %v827_v47 = vcombine.low %v794_v42, %v810_v40  ;;  %v828_v48 = vcombine.high %v794_v42, %v810_v40 }
 0x215   : > { %v629_v49 = vcombine.low %v548_v18, %v624_v43  ;;  %v630_v50 = vcombine.high %v548_v18, %v624_v43  ;;  %v645_v51 = vcombine.low %v621_v35, %v627_v44  ;;  %v646_v52 = vcombine.high %v621_v35, %v627_v44 }
 0x216   : > { %v819_v53 = vrot.slane %v811_v45, %v2736_v38  ;;  %v826_v54 = vrot.slane %v812_v46, %v2736_v38  ;;  %v835_v55 = vrot.slane %v827_v47, %v2736_v38  ;;  %v842_v56 = vrot.slane %v828_v48, %v2736_v38 }
 0x217   : > { %v637_v57 = vrot.slane %v629_v49, %v2724_v31  ;;  %v644_v58 = vrot.slane %v630_v50, %v2724_v31  ;;  %v653_v59 = vrot.slane %v645_v51, %v2724_v31  ;;  %v660_v60 = vrot.slane %v646_v52, %v2724_v31 }
 0x218   : > { %v847_v61 = vcombine.low %v819_v53, %v826_v54  ;;  %v1903_v62 = vcombine.high %v819_v53, %v826_v54  ;;  %v863_v63 = vcombine.low %v835_v55, %v842_v56  ;;  %v1904_v1 = vcombine.high %v835_v55, %v842_v56 }
 0x219   : > { %v661_v2 = vcombine.low %v637_v57, %v653_v59  ;;  %v662_v3 = vcombine.high %v637_v57, %v653_v59  ;;  %v677_v4 = vcombine.low %v644_v58, %v660_v60  ;;  %v678_v5 = vcombine.high %v644_v58, %v660_v60 }
 0x21a   : > { %v854_v7 = vrot.slane %v847_v61, %v2724_v31  ;;  %v862_v8 = vrot.slane %v1903_v62, %v2724_v31  ;;  %v870_v9 = vrot.slane %v863_v63, %v2724_v31  ;;  %v878_v10 = vrot.slane %v1904_v1, %v2724_v31 }
 0x21b   : > { %v669_v11 = vrot.slane %v661_v2, %v2736_v38  ;;  %v676_v13 = vrot.slane %v662_v3, %v2736_v38  ;;  %v685_v14 = vrot.slane %v677_v4, %v2736_v38  ;;  %v692_v15 = vrot.slane %v678_v5, %v2736_v38  ;;  %v483_v2 = vld [vmem:[#allocation7] sm:$0xff] }
 0x21c   : > { %v879_v16 = vcombine.low %v854_v7, %v862_v8  ;;  %v895_v17 = vcombine.low %v870_v9, %v878_v10  ;;  %v880_v18 = vcombine.high %v854_v7, %v862_v8  ;;  %v896_v19 = vcombine.high %v870_v9, %v878_v10 }
 0x21d   : > { %v697_v20 = vcombine.low %v669_v11, %v676_v13  ;;  %v1901_v21 = vcombine.high %v669_v11, %v676_v13  ;;  %v713_v22 = vcombine.low %v685_v14, %v692_v15  ;;  %v1902_v23 = vcombine.high %v685_v14, %v692_v15 }
 0x21e   : > { %v887_v24 = vrot.slane %v879_v16, %v2736_v38  ;;  %v903_v25 = vrot.slane %v895_v17, %v2736_v38  ;;  %v894_v36 = vrot.slane %v880_v18, %v2736_v38  ;;  %v910_v37 = vrot.slane %v896_v19, %v2736_v38 }
 0x21f   : > { %v704_v26 = vrot.slane %v697_v20, %v2724_v31  ;;  %v712_v27 = vrot.slane %v1901_v21, %v2724_v31  ;;  %v720_v30 = vrot.slane %v713_v22, %v2724_v31  ;;  %v728_v32 = vrot.slane %v1902_v23, %v2724_v31 }
 0x220   : > { %v911_v33 = vcombine.low %v887_v24, %v903_v25  ;;  %v912_v35 = vcombine.high %v887_v24, %v903_v25  ;;  %v913_v47 = vcombine.low %v894_v36, %v910_v37  ;;  %v914_v48 = vcombine.high %v894_v36, %v910_v37 }
 0x221   : > { %v729_v39 = vcombine.low %v704_v26, %v712_v27  ;;  %v745_v40 = vcombine.low %v720_v30, %v728_v32  ;;  %v730_v49 = vcombine.high %v704_v26, %v712_v27  ;;  %v746_v50 = vcombine.high %v720_v30, %v728_v32 }
 0x222   : > { %v915_v41 = vpack.c.bf16 %v911_v33, %v911_v33  ;;  %v916_v42 = vpack.c.bf16 %v912_v35, %v912_v35  ;;  %v917_v53 = vpack.c.bf16 %v913_v47, %v913_v47  ;;  %v918_v54 = vpack.c.bf16 %v914_v48, %v914_v48 }
 0x223   : > { %v737_v43 = vrot.slane %v729_v39, %v2736_v38  ;;  %v753_v44 = vrot.slane %v745_v40, %v2736_v38  ;;  %v744_v57 = vrot.slane %v730_v49, %v2736_v38  ;;  %v760_v58 = vrot.slane %v746_v50, %v2736_v38 }
 0x224   : > { %v1076_v45 = vsel %vm1071_vm2, %v915_v41, 0  ;;  %v1122_v46 = vsel %vm1071_vm2, %v916_v42, 0  ;;  %v1168_v59 = vsel %vm1071_vm2, %v917_v53, 0  ;;  %v1214_v60 = vsel %vm1071_vm2, %v918_v54, 0 }
 0x225   : > { %1969 = vmatpush3.bf16.xpose.msra.mxu0 %v1076_v45  ;;  %1975 = vmatpush3.bf16.xpose.msra.mxu1 %v1122_v46  ;;  %v761_v51 = vcombine.low %v737_v43, %v753_v44  ;;  %v762_v52 = vcombine.high %v737_v43, %v753_v44  ;;  %v763_v61 = vcombine.low %v744_v57, %v760_v58 }
 0x226   : > { %1980 = vmatprep.subr.bf16.mxu0 %v2374_v0  ;;  %1986 = vmatprep.subr.bf16.mxu1 %v2374_v0  ;;  %v764_v62 = vcombine.high %v744_v57, %v760_v58 }
 0x227   : > { %v765_v55 = vpack.c.bf16 %v761_v51, %v761_v51  ;;  %v766_v56 = vpack.c.bf16 %v762_v52, %v762_v52  ;;  %v767_v63 = vpack.c.bf16 %v763_v61, %v763_v61 }
 0x228   : > { %v768_v1 = vpack.c.bf16 %v764_v62, %v764_v62 }
 0x22c   : > { %1971 = vmatmul.mubr.msk.bf16.vlgmr.msra.gmra.mrb[4].mxu0 %vm1071_vm2, %v765_v55  ;;  %1977 = vmatmul.mubr.msk.bf16.vlgmr.msra.gmra.mrb[4].mxu1 %vm1071_vm2, %v766_v56 }
 0x22d   : > { %1981 = vmatpush3.bf16.xpose.msra.mxu0 %v1168_v59  ;;  %1987 = vmatpush3.bf16.xpose.msra.mxu1 %v1214_v60 }
 0x22e   : > { %1982 = vmatprep.mubr.msk.bf16.mxu0 %vm2375_vm0, %v2374_v0  ;;  %1988 = vmatprep.mubr.msk.bf16.mxu1 %vm2375_vm0, %v2374_v0 }
 0x22f   : > { %1992 = vmatprep.subr.bf16.mxu0 %v2374_v0  ;;  %1998 = vmatprep.subr.bf16.mxu1 %v2374_v0 }
 0x234   : > { %1983 = vmatmul.mubr.msk.bf16.vlgmr.msra.gmra.mrb[8].mxu0 %vm1071_vm2, %v767_v63  ;;  %1989 = vmatmul.mubr.msk.bf16.vlgmr.msra.gmra.mrb[8].mxu1 %vm1071_vm2, %v768_v1 }
 0x235   : > { %1994 = vmatprep.mubr.msk.bf16.mxu0 %vm2375_vm0, %v2374_v0  ;;  %2000 = vmatprep.mubr.msk.bf16.mxu1 %vm2375_vm0, %v2374_v0 }
 0x2ff   : > { %v1112_v3 = vpop.f32.mrb[4].mxu0  ;;  %v1158_v4 = vpop.f32.mrb[4].mxu1 }
 0x300   : > { %v1113_v5 = vadd.f32 %v1112_v3, %v483_v2  ;;  %v1159_v7 = vadd.f32 %v1158_v4, %v483_v2  ;;  %v1972_v8 = vpop.f32.mrb[5].mxu0  ;;  %v1978_v9 = vpop.f32.mrb[5].mxu1 }
 0x301   : > { %v1115_v10 = vpop.f32.mrb[6].mxu0  ;;  %v1161_v11 = vpop.f32.mrb[6].mxu1 }
 0x302   : > { %v1973_v13 = vpop.f32.mrb[7].mxu0  ;;  %v1979_v14 = vpop.f32.mrb[7].mxu1  ;;  %v1259_v15 = vsel %vm1071_vm2, %v1159_v7, -inf  ;;  %v1256_v16 = vsel %vm1071_vm2, %v1113_v5, -inf }
 0x303   : > { %1260 = vmax.xlane.f32.xlu1 %v1259_v15  ;;  %1257 = vmax.xlane.f32.xlu0 %v1256_v16 }
 0x307   : > { %v1204_v17 = vpop.f32.mrb[8].mxu0  ;;  %v1250_v18 = vpop.f32.mrb[8].mxu1 }
 0x308   : > { %v1205_v19 = vadd.f32 %v1204_v17, %v483_v2  ;;  %v1984_v20 = vpop.f32.mrb[9].mxu0  ;;  %v1990_v21 = vpop.f32.mrb[9].mxu1  ;;  %v1251_v24 = vadd.f32 %v1250_v18, %v483_v2 }
 0x309   : > { %v1207_v22 = vpop.f32.mrb[10].mxu0  ;;  %v1253_v23 = vpop.f32.mrb[10].mxu1 }
 0x30a   : > { %v1985_v25 = vpop.f32.mrb[11].mxu0  ;;  %v1991_v26 = vpop.f32.mrb[11].mxu1  ;;  %v1262_v27 = vsel %vm1071_vm2, %v1205_v19, -inf  ;;  %v1265_v30 = vsel %vm1071_vm2, %v1251_v24, -inf }
 0x30b   : > { %1263 = vmax.xlane.f32.xlu0 %v1262_v27 }
 0x30f   : > { %1266 = vmax.xlane.f32.xlu0 %v1265_v30 }
 0x314   : > { %919 = vrot.lane.b32.xlu1 %v2715_v12, %s2381_s11 }
 0x390   : > { %v1261_v32 = vpop.xlane.xlu1 %1260  ;;  %v1258_v33 = vpop.xlane.xlu0 %1257 }
 0x391   : > { %v1269_v35 = vsub.f32 %v1159_v7, %v1261_v32  ;;  %v1268_v36 = vsub.f32 %v1113_v5, %v1258_v33 }
 0x393   : > { %v1274_v37 = vmul.f32 1.442695, %v1269_v35  ;;  %v1272_v39 = vmul.f32 1.442695, %v1268_v36 }
 0x395   : > { %2125 = vpow2.f32 %v1274_v37 }
 0x396   : > { %2127 = vpow2.f32 %v1272_v39 }
 0x398   : > { %v1264_v12 = vpop.xlane.xlu0 %1263 }
 0x399   : > { %v1270_v44 = vsub.f32 %v1205_v19, %v1264_v12 }
 0x39b   : > { %v1276_v46 = vmul.f32 1.442695, %v1270_v44 }
 0x39c   : > { %v1267_v45 = vpop.xlane.xlu0 %1266 }
 0x39d   : > { %v1271_v47 = vsub.f32 %v1251_v24, %v1267_v45  ;;  %2129 = vpow2.f32 %v1276_v46 }
 0x39f   : > { %v2795_v40 = vpop.eup %2125  ;;  %v1278_v48 = vmul.f32 1.442695, %v1271_v47 }
 0x3a0   : > { %v2797_v41 = vpop.eup %2127  ;;  %v1283_v42 = vsel %vm1071_vm2, %v2795_v40, 0.0 }
 0x3a1   : > { %v1280_v43 = vsel %vm1071_vm2, %v2797_v41, 0.0  ;;  %1284 = vadd.xlane.f32.xlu0 %v1283_v42  ;;  %2131 = vpow2.f32 %v1278_v48 }
 0x3a2   : > { %1281 = vadd.xlane.f32.xlu1 %v1280_v43 }
 0x3a7   : > { %v2806_v49 = vpop.eup %2129 }
 0x3a8   : > { %v1286_v50 = vsel %vm1071_vm2, %v2806_v49, 0.0 }
 0x3ab   : > { %v2810_v51 = vpop.eup %2131 }
 0x3b3   : > { %923 = vrot.lane.b32.xlu1 %v2730_v34, %s2381_s11 }
 0x3b7   : > { %925 = vrot.lane.b32.xlu1 %v2720_v28, %s2381_s11  ;;  %921 = vrot.lane.b32.xlu0 %v2722_v29, %s2381_s11  ;;  %v1289_v28 = vsel %vm1071_vm2, %v2810_v51, 0.0  ;;  %v920_v29 = vpop.permute.xlu1 %919  ;;  %s2978_s11 = smov %s2977_s17 }
 0x3d6   : > { %1287 = vadd.xlane.f32.xlu0 %v1286_v50 }
 0x3db   : > { %1290 = vadd.xlane.f32.xlu1 %v1289_v28 }
 0x42e   : > { %v1285_v52 = vpop.xlane.xlu0 %1284 }
 0x42f   : > { %v1282_v34 = vpop.xlane.xlu1 %1281  ;;  %2133 = vrcp.f32 %v1285_v52 }
 0x430   : > { %2135 = vrcp.f32 %v1282_v34 }
 0x432   : > { %v922_v56 = vpop.permute.xlu0 %921 }
 0x433   : > { %v924_v53 = vpop.permute.xlu1 %923 }
 0x434   : > { %v931_v54 = vcombine.low %v920_v29, %v924_v53  ;;  %v932_v55 = vcombine.high %v920_v29, %v924_v53 }
 0x436   : > { %v939_v60 = vrot.slane %v931_v54, %v2724_v31  ;;  %v946_v61 = vrot.slane %v932_v55, %v2724_v31 }
 0x437   : > { %v926_v57 = vpop.permute.xlu1 %925 }
 0x438   : > { %v947_v58 = vcombine.low %v922_v56, %v926_v57  ;;  %v948_v59 = vcombine.high %v922_v56, %v926_v57 }
 0x439   : > { %v2134_v23 = vpop.eup %2133 }
 0x43a   : > { %v955_v62 = vrot.slane %v947_v58, %v2724_v31  ;;  %v962_v63 = vrot.slane %v948_v59, %v2724_v31  ;;  %v2136_v30 = vpop.eup %2135  ;;  %v1297_v39 = vmul.f32 %v2134_v23, %v2795_v40 }
 0x43b   : > { %v1296_v37 = vmul.f32 %v2136_v30, %v2797_v41 }
 0x43c   : > { %v963_v1 = vcombine.low %v939_v60, %v955_v62  ;;  %v964_v2 = vcombine.high %v939_v60, %v955_v62  ;;  %v979_v3 = vcombine.low %v946_v61, %v962_v63  ;;  %v980_v4 = vcombine.high %v946_v61, %v962_v63 }
 0x43d   : > { %v1300_v47 = vpack.c.bf16 %v1296_v37, %v1296_v37  ;;  %v1301_v48 = vpack.c.bf16 %v1297_v39, %v1297_v39 }
 0x43e   : > { %v971_v5 = vrot.slane %v963_v1, %v2736_v38  ;;  %v978_v7 = vrot.slane %v964_v2, %v2736_v38  ;;  %v987_v8 = vrot.slane %v979_v3, %v2736_v38  ;;  %v994_v9 = vrot.slane %v980_v4, %v2736_v38 }
 0x440   : > { %v999_v10 = vcombine.low %v971_v5, %v978_v7  ;;  %v1905_v11 = vcombine.high %v971_v5, %v978_v7  ;;  %v1015_v13 = vcombine.low %v987_v8, %v994_v9  ;;  %v1906_v14 = vcombine.high %v987_v8, %v994_v9 }
 0x442   : > { %v1006_v15 = vrot.slane %v999_v10, %v2724_v31  ;;  %v1014_v16 = vrot.slane %v1905_v11, %v2724_v31  ;;  %v1022_v17 = vrot.slane %v1015_v13, %v2724_v31  ;;  %v1030_v18 = vrot.slane %v1906_v14, %v2724_v31 }
 0x444   : > { %v1031_v19 = vcombine.low %v1006_v15, %v1014_v16  ;;  %v1047_v20 = vcombine.low %v1022_v17, %v1030_v18  ;;  %v1032_v21 = vcombine.high %v1006_v15, %v1014_v16  ;;  %v1048_v22 = vcombine.high %v1022_v17, %v1030_v18 }
 0x446   : > { %v1039_v24 = vrot.slane %v1031_v19, %v2736_v38  ;;  %v1055_v25 = vrot.slane %v1047_v20, %v2736_v38  ;;  %v1046_v26 = vrot.slane %v1032_v21, %v2736_v38  ;;  %v1062_v27 = vrot.slane %v1048_v22, %v2736_v38  ;;  %v2123_v21 = vld [vmem:[#allocation10] sm:$0xff]  }
 0x448   : > { %v1063_v32 = vcombine.low %v1039_v24, %v1055_v25  ;;  %v1064_v33 = vcombine.high %v1039_v24, %v1055_v25  ;;  %v1065_v35 = vcombine.low %v1046_v26, %v1062_v27  ;;  %v1066_v36 = vcombine.high %v1046_v26, %v1062_v27 }
 0x44a   : > { %v1067_v42 = vpack.c.bf16 %v1063_v32, %v1063_v32  ;;  %v1068_v43 = vpack.c.bf16 %v1064_v33, %v1064_v33  ;;  %v1069_v45 = vpack.c.bf16 %v1065_v35, %v1065_v35  ;;  %v1070_v46 = vpack.c.bf16 %v1066_v36, %v1066_v36  ;;  %v2124_v33 = vld [vmem:[#allocation10 + $0x8] sm:$0xff]  }
 0x44c   : > { %v1309_v12 = vsel %vm1307_vm3, %v1067_v42, 0  ;;  %v1355_v44 = vsel %vm1307_vm3, %v1068_v43, 0  ;;  %v1401_v40 = vsel %vm1307_vm3, %v1069_v45, 0  ;;  %v1447_v41 = vsel %vm1307_vm3, %v1070_v46, 0 }
 0x44d   : > { %1993 = vmatpush3.bf16.msra.mxu0 %v1309_v12  ;;  %1999 = vmatpush3.bf16.msra.mxu1 %v1355_v44 }
 0x44e   : > { %2004 = vmatprep.subr.bf16.mxu0 %v2374_v0  ;;  %2010 = vmatprep.subr.bf16.mxu1 %v2374_v0 }
 0x450   : > { %1995 = vmatmul.mubr.msk.bf16.vlgmr.msra.gmra.mrb[12].mxu0 %vm1071_vm2, %v1300_v47  ;;  %2001 = vmatmul.mubr.msk.bf16.vlgmr.msra.gmra.mrb[12].mxu1 %vm1071_vm2, %v1301_v48 }
 0x451   : > { %2005 = vmatpush3.bf16.msra.mxu0 %v1401_v40  ;;  %2011 = vmatpush3.bf16.msra.mxu1 %v1447_v41 }
 0x452   : > { %2006 = vmatprep.mubr.msk.bf16.mxu0 %vm2375_vm0, %v2374_v0  ;;  %2012 = vmatprep.mubr.msk.bf16.mxu1 %vm2375_vm0, %v2374_v0 }
 0x453   : > { %2016 = vmatprep.subr.bf16.mxu0 %v2374_v0 }
 0x463   : > { %v1288_v50 = vpop.xlane.xlu0 %1287 }
 0x464   : > { %2137 = vrcp.f32 %v1288_v50 }
 0x468   : > { %v1291_v28 = vpop.xlane.xlu1 %1290 }
 0x469   : > { %2139 = vrcp.f32 %v1291_v28 }
 0x46e   : > { %v2138_v29 = vpop.eup %2137 }
 0x46f   : > { %v1298_v34 = vmul.f32 %v2138_v29, %v2806_v49 }
 0x471   : > { %v1302_v52 = vpack.c.bf16 %v1298_v34, %v1298_v34 }
 0x473   : > { %v2140_v53 = vpop.eup %2139  ;;  %2007 = vmatmul.mubr.msk.bf16.vlgmr.msra.gmra.mrb[16].mxu0 %vm1071_vm2, %v1302_v52 }
 0x474   : > { %v1299_v54 = vmul.f32 %v2140_v53, %v2810_v51  ;;  %2020 = vmatprep.mubr.msk.bf16.mxu0 %vm2375_vm0, %v2374_v0  ;;  %2017 = vmatpush3.bf16.msra.mxu0 %v2123_v21 }
 0x475   : > { %2018 = vmatprep.subr.bf16.mxu0 %v2374_v0 }
 0x476   : > { %v1303_v55 = vpack.c.bf16 %v1299_v54, %v1299_v54  ;;  %v1917_v54 = vld [vmem:[%s2940_s8] ss:$0 sm:$0xff] }
 0x478   : > { %2013 = vmatmul.mubr.msk.bf16.vlgmr.msra.gmra.mrb[16].mxu1 %vm1071_vm2, %v1303_v55  ;;  %2019 = vmatpush3.bf16.msra.mxu0 %v2124_v33 }
 0x523   : > { %v1345_v56 = vpop.f32.mrb[12].mxu0  ;;  %v1391_v57 = vpop.f32.mrb[12].mxu1 }
 0x524   : > { %v1996_v58 = vpop.f32.mrb[13].mxu0  ;;  %v2002_v59 = vpop.f32.mrb[13].mxu1 }
 0x525   : > { %v1348_v60 = vpop.f32.mrb[14].mxu0  ;;  %v1394_v61 = vpop.f32.mrb[14].mxu1 }
 0x526   : > { %v1997_v62 = vpop.f32.mrb[15].mxu0  ;;  %v2003_v49 = vpop.f32.mrb[15].mxu1 }
 0x546   : > { %v1437_v63 = vpop.f32.mrb[16].mxu0 }
 0x547   : > { %v1489_v1 = vcombine.low %v1345_v56, %v1437_v63  ;;  %v1490_v2 = vcombine.high %v1345_v56, %v1437_v63  ;;  %v2008_v3 = vpop.f32.mrb[17].mxu0 }
 0x548   : > { %v1440_v4 = vpop.f32.mrb[18].mxu0 }
 0x549   : > { %v2009_v51 = vpop.f32.mrb[19].mxu0  ;;  %v1497_v11 = vrot.slane %v1489_v1, %v2724_v31  ;;  %v1504_v13 = vrot.slane %v1490_v2, %v2724_v31 }
 0x54b   : > { %v1483_v5 = vpop.f32.mrb[16].mxu1 }
 0x54c   : > { %v1505_v7 = vcombine.low %v1391_v57, %v1483_v5  ;;  %v1506_v8 = vcombine.high %v1391_v57, %v1483_v5  ;;  %v2014_v9 = vpop.f32.mrb[17].mxu1 }
 0x54d   : > { %v1486_v10 = vpop.f32.mrb[18].mxu1 }
 0x54e   : > { %v1513_v14 = vrot.slane %v1505_v7, %v2724_v31  ;;  %v1520_v15 = vrot.slane %v1506_v8, %v2724_v31  ;;  %v2015_v16 = vpop.f32.mrb[19].mxu1  ;;  %v1922_v8 = vld [vmem:[%s2942_s10] ss:$0 sm:$0xff] }
 0x550   : > { %v1521_v17 = vcombine.low %v1497_v11, %v1513_v14  ;;  %v1522_v18 = vcombine.high %v1497_v11, %v1513_v14  ;;  %v1537_v19 = vcombine.low %v1504_v13, %v1520_v15  ;;  %v1538_v20 = vcombine.high %v1504_v13, %v1520_v15 }
 0x552   : > { %v1529_v22 = vrot.slane %v1521_v17, %v2736_v38  ;;  %v1536_v23 = vrot.slane %v1522_v18, %v2736_v38  ;;  %v1545_v24 = vrot.slane %v1537_v19, %v2736_v38  ;;  %v1552_v25 = vrot.slane %v1538_v20, %v2736_v38 }
 0x554   : > { %v1557_v26 = vcombine.low %v1529_v22, %v1536_v23  ;;  %v1915_v27 = vcombine.high %v1529_v22, %v1536_v23  ;;  %v1573_v30 = vcombine.low %v1545_v24, %v1552_v25  ;;  %v1916_v32 = vcombine.high %v1545_v24, %v1552_v25 }
 0x556   : > { %v1564_v35 = vrot.slane %v1557_v26, %v2724_v31  ;;  %v1572_v36 = vrot.slane %v1915_v27, %v2724_v31  ;;  %v1580_v37 = vrot.slane %v1573_v30, %v2724_v31  ;;  %v1588_v39 = vrot.slane %v1916_v32, %v2724_v31 }
 0x558   : > { %v1590_v42 = vcombine.high %v1564_v35, %v1572_v36  ;;  %v1606_v43 = vcombine.high %v1580_v37, %v1588_v39  ;;  %v1589_v12 = vcombine.low %v1564_v35, %v1572_v36  ;;  %v1605_v44 = vcombine.low %v1580_v37, %v1588_v39 }
 0x55a   : > { %v1604_v0 = vrot.slane %v1590_v42, %v2736_v38  ;;  %v1620_v45 = vrot.slane %v1606_v43, %v2736_v38  ;;  %v1597_v46 = vrot.slane %v1589_v12, %v2736_v38  ;;  %v1613_v47 = vrot.slane %v1605_v44, %v2736_v38 }
 0x55c   : > { %v1623_v48 = vcombine.low %v1604_v0, %v1620_v45  ;;  %v1622_v40 = vcombine.high %v1597_v46, %v1613_v47  ;;  %v1624_v41 = vcombine.high %v1604_v0, %v1620_v45  ;;  %v1621_v50 = vcombine.low %v1597_v46, %v1613_v47 }
 0x55e   : > { %1630 = vrot.lane.b32.xlu1 %v1623_v48, %s2382_s27  ;;  %1626 = vrot.lane.b32.xlu0 %v1622_v40, %s2383_s25  ;;  %s2887_s27 = scalar_lea.hbm %s2977_s17, %s1924_s12  ;;  %s1742_s25 = scalar_lea.sflag [#allocation4], %s2658_s7 }
 0x562   : > { %1634 = vrot.lane.b32.xlu0 %v1624_v41, %s2384_s29  ;;  %s2287_s29 = scalar_lea.vmem %s2889_s13, 128 }
 0x563   : > { %p2288_p3 = scmp.ne.s32.totalorder %s2889_s13, %s2287_s29  ;;  %p2295_p9 = scmp.lt.s32.totalorder %s2293_s30, %s2287_s29 }
 0x565   : > { %p2289_p10 = pnand %p2288_p3, %p2979_p7  ;;  %p2296_p1 = por %p2295_p9, %p2294_p5 }
 0x567   : > { %p2290_p13 = pneg %p2289_p10 }
 0x569   : > { %p2297_p2 = pnand %p2296_p1, %p2290_p13 }
 0x5d0   : > { %v1627_v31 = vpop.permute.xlu0 %1626  ;;  %v1631_v28 = vpop.permute.xlu1 %1630 }
 0x5d1   : > { %v1637_v29 = vsel %vm1071_vm2, %v1621_v50, %v1627_v31 }
 0x5d2   : > { %v1639_v52 = vsel %vm1638_vm4, %v1637_v29, %v1631_v28 }
 0x5d4   : > { %v1635_v34 = vpop.permute.xlu0 %1634 }
 0x5d5   : > { %v1641_v53 = vsel %vm1640_vm5, %v1639_v52, %v1635_v34 }
 0x5d6   : > { %v1642_v38 = vpack.c.bf16 %v1641_v53, %v1641_v53 }
 0x5d8   : > { %2021 = vmatmul.mubr.msk.bf16.vlgmr.msra.gmra.mrb[20].mxu0 %vm509_vm1, %v1642_v38 }
 0x6ab   : > { %v1703_v55 = vpop.f32.mrb[20].mxu0 }
 0x6ac   : > { %v1704_v56 = vadd.f32 %v1917_v54, %v1703_v55  ;;  %v2022_v57 = vpop.f32.mrb[21].mxu0 }
 0x6ad   : > { %v1706_v58 = vpop.f32.mrb[22].mxu0 }
 0x6ae   : > { %v2023_v59 = vpop.f32.mrb[23].mxu0  ;;  %v1709_v60 = vadd.f32 %v1704_v56, %v2697_v6  ;;  %v1921_v6 = vld [vmem:[%s2941_s9] ss:$0 sm:$0xff] }
 0x6b0   : > { %v1710_v61 = vsel %vm509_vm1, %v1709_v60, 0.0 }
 0x6b1   : > { %1711 = vadd.xlane.f32.xlu1 %v1710_v61 }
 0x73e   : > { %v1712_v62 = vpop.xlane.xlu1 %1711 }
 0x73f   : > { %v1714_v49 = vmul.f32 0.03125, %v1712_v62 }
 0x741   : > { %v1715_v63 = vsub.f32 %v1709_v60, %v1714_v49 }
 0x743   : > { %v1716_v1 = vmul.f32 %v1715_v63, %v1715_v63 }
 0x745   : > { %v1717_v2 = vsel %vm509_vm1, %v1716_v1, 0.0 }
 0x746   : > { %1718 = vadd.xlane.f32.xlu0 %v1717_v2 }
 0x7d3   : > { %v1719_v3 = vpop.xlane.xlu0 %1718 }
 0x7d4   : > { %v1720_v4 = vmul.f32 0.03125, %v1719_v3 }
 0x7d6   : > { %v1721_v51 = vadd.f32 1e-06, %v1720_v4 }
 0x7d8   : > { %2141 = vrsqrt.f32 %v1721_v51 }
 0x7e2   : > { %v2142_v5 = vpop.eup %2141 }
 0x7e3   : > { %v1723_v7 = vmul.f32 %v2142_v5, %v1715_v63 }
 0x7e5   : > { %v1731_v9 = vmul.f32 %v1921_v6, %v1723_v7 }
 0x7e7   : > { %v1739_v10 = vadd.f32 %v1922_v8, %v1731_v9 }
 0x7e9   : > { %1740 = vst.msk [vmem:[%s479_s19] sm:$0xff] %vm509_vm1, %v1739_v10 }
 0x7ea   : > { %2300 = shalt.err (!%p2297_p2)
}
 0x7eb   : > { %s2301_s7 = scalar_lea.hbm %s2887_s27, 128  ;;  %s2305_s28 = scalar_lea.hbm %s2978_s11, 256 }
 0x7ec   : > { %p2302_p12 = scmp.ne.s32.totalorder %s2887_s27, %s2301_s7  ;;  %p2306_p0 = scmp.lt.u32.totalorder %s2887_s27, %s2978_s11 }
 0x7ed   : > { %p2307_p4 = scmp.lt.u32.totalorder %s2305_s28, %s2301_s7  ;;  %p2309_p3 = scmp.lt.u32.totalorder %s2301_s7, %s2887_s27 }
 0x7ee   : > { %p2303_p6 = pnand %p2302_p12, %p2979_p7 }
 0x7ef   : > { %p2308_p8 = por %p2307_p4, %p2306_p0 }
 0x7f0   : > { %p2304_p11 = pneg %p2303_p6 }
 0x7f1   : > { %p2310_p10 = por %p2309_p3, %p2308_p8 }
 0x7f3   : > { %p2311_p13 = pnand %p2310_p10, %p2304_p11 }
 0x7f5   : > { %2314 = shalt.err (!%p2311_p13)
}
 0x7f6   : > { %2040 = dma.vmem_to_hbm [thread:$0]  (%p2979_p7), %s2889_s13, 128, %s2887_s27, %s1742_s25  }
 0x7f7 PF: > { %s2980_s12 = sld [smem:[#allocation17_spill]]  ;;  %s2981_s19 = sld [smem:[#allocation19_spill]] }
 0x7f8   : > { %p2983_p9 = scmp.ge.s32.totalorder %s2365_s20, 2 }
 0x7fd   : > { %s1767_s14 = sand.u32 1, %s2980_s12   ;;  %p2982_p5 = scmp.ne.s32.totalorder %s2981_s19, 0 }
 0x7fe   : > { %s1768_s15 = scalar_lea.sflag [#allocation4], %s1767_s14 }
 0x7ff   : > { %p2060_p1 = pnand %p2983_p9, %p2982_p5 }
 0x801   : > { %2348 = dma.done.wait (!%p2060_p1), %s1768_s15, 128  }
 0x802   : > { %2350 = vsyncadd (!%p2060_p1), %s1768_s15, 4294967168  ;;  %s2984_s29 = sld [smem:[#allocation18_spill]]  ;;  %s2985_s19 = sld [smem:[#allocation20_spill]] }
 0x803   : > { %p28_p2 = scmp.ge.s32.totalorder %s2570_s2, 4   ;;  %s2986_s17 = smov %s2357_s18 }
 0x804   : > { %s2988_s20 = smov %s2570_s2 }
 0x805   :  { %30 = sbr.rel (!%p28_p2) target bundleno = 13 (0xd), region = 134 }
 0x808   : > { %s2987_s18 = smov %s2984_s29 }
 0x80c   :  { %1773 = vsyncpa [#allocation3], 1 }
 0x80d   :  { %1775 = vsyncpa [#allocation3 + $0x1], 1 }
 0x80e   :  { %1776 = vsyncpa [#allocation6], 1 }
 0x80f   :  { %1778 = vsyncpa [#allocation6 + $0x1], 1 }
 0x810   :  { %1779 = vsyncpa [#allocation9], 1 }
 0x811   :  { %1780 = vsyncpa [#allocation4], 1 }
 0x812   :  { %1782 = vsyncpa [#allocation4 + $0x1], 1 }

</bundles_post_ra>
